<compile_context>
chip_gen: v5e
topology: v5e:2x2
jax: 0.10.0
libtpu: 0.0.40
codegen_flags: <defaults>
</compile_context>

<pallas_src>
import jax
import jax.numpy as jnp
from jax import lax
from jax.experimental import pallas as pl
from jax.experimental.pallas import tpu as pltpu

MAX_BLOCK_ROWS = 32       # packed rows per grid step (each row = PACK sentences)
FULL_UNROLL_MAX_SEQ = 16  # fully unroll the recurrence up to this static seq_len


def _round_up(x, m):
    return (x + m - 1) // m * m


def _mxu_lane_width():
    """MXU column width: 256 on v6e/v7x, 128 otherwise (v5e & older / unknown)."""
    try:
        kind = jax.devices()[0].device_kind.lower()
    except Exception:
        return 128
    return 256 if any(tag in kind for tag in ("v6", "v7", "tpu7")) else 128


def _rnn_block_kernel(x_ref, wih_bd_ref, whh_bd_ref, bias_ref, h_out_ref, xw_ref):
    # x_ref:      (seq_len*rows, PACK*E)  time-major: rows [t*rows:(t+1)*rows] = step t
    # wih_bd_ref: (PACK*E, PACK*H)        block-diagonal W_ih^T (PACK copies)
    # whh_bd_ref: (PACK*H, PACK*H)        block-diagonal W_hh^T (PACK copies)
    # bias_ref:   (1, PACK*H)             b_ih + b_hh, tiled PACK times
    # h_out_ref:  (rows, PACK*H)          final packed hidden state (lane-dense store)
    # xw_ref:     (seq_len*rows, PACK*H)  VMEM scratch for the input projection
    rows, lanes = h_out_ref.shape
    seq_len = x_ref.shape[0] // rows

    # One fused MXU matmul for every (timestep, packed-row) input contribution;
    # parked in VMEM scratch so it does not pin vregs across the recurrence.
    xw_ref[...] = (
        jnp.dot(x_ref[...], wih_bd_ref[...], preferred_element_type=jnp.float32)
        + bias_ref[...]
    )

    # Keep W_hh_bd resident in vregs only when it is small (128x128 f32 = 16 vregs);
    # a 256-wide packed W_hh would eat the whole vreg file, so load it per step then
    # (the loads are off the h critical path).
    keep_whh_in_vregs = lanes <= 128
    whh_resident = whh_bd_ref[...] if keep_whh_in_vregs else None

    def recur(h, xw_t):
        rhs = whh_resident if keep_whh_in_vregs else whh_bd_ref[...]
        rec = jnp.dot(h, rhs, preferred_element_type=jnp.float32)
        return jnp.maximum(xw_t + rec, 0.0)

    h0 = jnp.zeros((rows, lanes), jnp.float32)

    if seq_len <= FULL_UNROLL_MAX_SEQ:
        # Fully unrolled: static xw slices, LLO scheduler sees across timesteps.
        h = h0
        for t in range(seq_len):
            h = recur(h, xw_ref[pl.ds(t * rows, rows), :])
    else:
        # Long sequences: partially unrolled loop bounds code size / vreg pressure.
        def step(t, h):
            start = pl.multiple_of(t * rows, rows)
            return recur(h, xw_ref[pl.ds(start, rows), :])

        h = lax.fori_loop(0, seq_len, step, h0, unroll=4)

    h_out_ref[...] = h


@jax.jit
def sentence_encoder_forward_batched(x, w_ih, w_hh, b_ih, b_hh):
    """x: (B, seq_len, embed_dim) -> final hidden state (B, hidden_dim), float32."""
    batch, seq_len, embed_dim = x.shape
    hidden_dim = w_ih.shape[0]

    # Lane packing factor: PACK sentences share one packed row of PACK*H lanes.
    pack = max(1, _mxu_lane_width() // hidden_dim)

    rows_needed = -(-batch // pack)                               # ceil(batch / pack)
    block_rows = min(MAX_BLOCK_ROWS, _round_up(rows_needed, 8))   # >= one sublane tile
    rows_total = _round_up(rows_needed, block_rows)
    num_blocks = rows_total // block_rows
    padded_batch = rows_total * pack

    # Single host-side relayout (pad + lane-pack + time-major inside each block);
    # fused by XLA under jit, padded sentences are all-zero and discarded at the end.
    if padded_batch != batch:
        x = jnp.pad(x, ((0, padded_batch - batch), (0, 0), (0, 0)))
    x_packed = (
        x.reshape(num_blocks, block_rows, pack, seq_len, embed_dim)
        .transpose(0, 3, 1, 2, 4)                  # (blk, t, row, p, e)
        .reshape(num_blocks, seq_len * block_rows, pack * embed_dim)
    )

    # Block-diagonal weights: kron(eye, W^T) has exactly-zero off-diagonal blocks,
    # so packed sentences cannot leak into each other.
    eye_p = jnp.eye(pack, dtype=jnp.float32)
    wih_bd = jnp.kron(eye_p, w_ih.T.astype(jnp.float32))          # (pack*E, pack*H)
    whh_bd = jnp.kron(eye_p, w_hh.T.astype(jnp.float32))          # (pack*H, pack*H)
    bias_p = jnp.tile((b_ih + b_hh).reshape(1, hidden_dim).astype(jnp.float32),
                      (1, pack))                                  # (1, pack*H)

    lanes = pack * hidden_dim
    h_packed = pl.pallas_call(
        _rnn_block_kernel,
        out_shape=jax.ShapeDtypeStruct((rows_total, lanes), jnp.float32),
        grid=(num_blocks,),
        in_specs=[
            pl.BlockSpec((None, seq_len * block_rows, pack * embed_dim),
                         lambda b: (b, 0, 0)),                          # x block
            pl.BlockSpec((pack * embed_dim, lanes), lambda b: (0, 0)),  # W_ih^T bd (resident)
            pl.BlockSpec((lanes, lanes), lambda b: (0, 0)),             # W_hh^T bd (resident)
            pl.BlockSpec((1, lanes), lambda b: (0, 0)),                 # bias     (resident)
        ],
        out_specs=pl.BlockSpec((block_rows, lanes), lambda b: (b, 0)),
        scratch_shapes=[pltpu.VMEM((seq_len * block_rows, lanes), jnp.float32)],
        compiler_params=pltpu.CompilerParams(
            dimension_semantics=("parallel",)),     # batch blocks across TCs (v7x megacore)
    )(x_packed, wih_bd, whh_bd, bias_p)

    # Unpack lanes back to one sentence per row, drop padding.
    return h_packed.reshape(rows_total * pack, hidden_dim)[:batch]


def sentence_encoder_forward(x, w_ih, w_hh, b_ih, b_hh):
    """Module-equivalent forward. x: (seq_len, embed_dim) -> (1, 1, hidden_dim)."""
    # B=1 path is launch/overhead dominated by construction; per review it simply
    # reuses the batched kernel and is not tuned further.
    hidden_dim = w_ih.shape[0]
    h = sentence_encoder_forward_batched(x[None], w_ih, w_hh, b_ih, b_hh)
    return h[0].reshape(1, 1, hidden_dim)


if __name__ == "__main__":
    embed_dim = 16
    hidden_dim = 32
    seq_len = 8

    key = jax.random.PRNGKey(0)
    kx, kb, kc, k1, k2, k3, k4 = jax.random.split(key, 7)

    # Deterministic parameter init, mimicking nn.RNN's U(-1/sqrt(H), 1/sqrt(H))
    bound = 1.0 / (hidden_dim ** 0.5)
    w_ih = jax.random.uniform(k1, (hidden_dim, embed_dim), jnp.float32, -bound, bound)
    w_hh = jax.random.uniform(k2, (hidden_dim, hidden_dim), jnp.float32, -bound, bound)
    b_ih = jax.random.uniform(k3, (hidden_dim,), jnp.float32, -bound, bound)
    b_hh = jax.random.uniform(k4, (hidden_dim,), jnp.float32, -bound, bound)

    def ref_batched(xb):
        # PyTorch nn.RNN(relu) recurrence, batched, pure jnp reference.
        h = jnp.zeros((xb.shape[0], hidden_dim), jnp.float32)
        for t in range(xb.shape[1]):
            h = jnp.maximum(xb[:, t, :] @ w_ih.T + b_ih + h @ w_hh.T + b_hh, 0.0)
        return h

    # 1) Exact module semantics: single sentence -> (1, 1, hidden_dim)
    x = jax.random.normal(kx, (seq_len, embed_dim), jnp.float32)
    hidden = jax.block_until_ready(sentence_encoder_forward(x, w_ih, w_hh, b_ih, b_hh))
    assert hidden.shape == (1, 1, hidden_dim)
    assert jnp.allclose(hidden.reshape(1, hidden_dim), ref_batched(x[None]),
                        atol=1e-4, rtol=1e-4)

    # 2) Batched throughput path: enough sentences for >= 2 grid blocks, with
    #    ragged padding (batch not a multiple of the packed block size).
    pack = max(1, _mxu_lane_width() // hidden_dim)
    batch = 2 * MAX_BLOCK_ROWS * pack + 5
    xb = jax.random.normal(kb, (batch, seq_len, embed_dim), jnp.float32)
    hb = jax.block_until_ready(
        sentence_encoder_forward_batched(xb, w_ih, w_hh, b_ih, b_hh))
    assert hb.shape == (batch, hidden_dim)
    assert jnp.allclose(hb, ref_batched(xb), atol=1e-4, rtol=1e-4)

    # 3) Long-sequence path (exercises the lax.fori_loop(unroll=4) branch).
    long_seq = 24
    xc = jax.random.normal(kc, (10, long_seq, embed_dim), jnp.float32)
    hc = jax.block_until_ready(
        sentence_encoder_forward_batched(xc, w_ih, w_hh, b_ih, b_hh))
    assert hc.shape == (10, hidden_dim)
    assert jnp.allclose(hc, ref_batched(xc), atol=1e-4, rtol=1e-4)

    print("KERNEL_OK")
</pallas_src>

<mosaic_0001>
module attributes {stable_mosaic.version = 11 : i64} {
  func.func @_rnn_block_kernel(%arg0: i32, %arg1: memref<1x64x64xf32, #tpu.memory_space<vmem>>, %arg2: memref<64x128xf32, #tpu.memory_space<vmem>>, %arg3: memref<128x128xf32, #tpu.memory_space<vmem>>, %arg4: memref<1x128xf32, #tpu.memory_space<vmem>>, %arg5: memref<8x128xf32, #tpu.memory_space<vmem>>, %arg6: memref<64x128xf32, #tpu.memory_space<vmem>>) attributes {dimension_semantics = [#tpu.dimension_semantics<parallel>], iteration_bounds = array<i64: 1>, scalar_prefetch = 0 : i64, scratch_operands = 1 : i64, tpu.core_type = #tpu.core_type<tc>, window_params = [{transform_indices = @transform_0, window_bounds = array<i64: 1, 64, 64>}, {pipeline_mode = #tpu.pipeline_mode<synchronous>, transform_indices = @transform_1, window_bounds = array<i64: 64, 128>}, {pipeline_mode = #tpu.pipeline_mode<synchronous>, transform_indices = @transform_2, window_bounds = array<i64: 128, 128>}, {pipeline_mode = #tpu.pipeline_mode<synchronous>, transform_indices = @transform_3, window_bounds = array<i64: 1, 128>}, {transform_indices = @transform_4, window_bounds = array<i64: 8, 128>}]} {
    %c0 = arith.constant 0 : index
    %c0_0 = arith.constant 0 : index
    %c0_1 = arith.constant 0 : index
    %0 = vector.load %arg1[%c0, %c0_0, %c0_1] : memref<1x64x64xf32, #tpu.memory_space<vmem>>, vector<1x64x64xf32>
    %1 = vector.shape_cast %0 : vector<1x64x64xf32> to vector<64x64xf32>
    %c0_2 = arith.constant 0 : index
    %c0_3 = arith.constant 0 : index
    %2 = vector.load %arg2[%c0_2, %c0_3] : memref<64x128xf32, #tpu.memory_space<vmem>>, vector<64x128xf32>
    %cst = arith.constant dense<0.000000e+00> : vector<64x128xf32>
    %3 = tpu.matmul %1, %2, %cst {dimension_numbers = #tpu.dot_dimension_numbers<[1], [0], [0], [1], [0, 0, 1, 1], [], []>} : vector<64x64xf32>, vector<64x128xf32>, vector<64x128xf32> -> vector<64x128xf32>
    %c0_4 = arith.constant 0 : index
    %c0_5 = arith.constant 0 : index
    %4 = vector.load %arg4[%c0_4, %c0_5] : memref<1x128xf32, #tpu.memory_space<vmem>>, vector<1x128xf32>
    %5 = vector.broadcast %4 : vector<1x128xf32> to vector<64x128xf32>
    %6 = arith.addf %3, %5 : vector<64x128xf32>
    %c0_6 = arith.constant 0 : index
    %c0_7 = arith.constant 0 : index
    %7 = vector.load %arg6[%c0_6, %c0_7] : memref<64x128xf32, #tpu.memory_space<vmem>>, vector<64x128xf32>
    tpu.vector_store %arg6[%c0_6, %c0_7], %6 {strides = array<i32>} : memref<64x128xf32, #tpu.memory_space<vmem>>, vector<64x128xf32>,
    %c0_8 = arith.constant 0 : index
    %c0_9 = arith.constant 0 : index
    %8 = vector.load %arg3[%c0_8, %c0_9] : memref<128x128xf32, #tpu.memory_space<vmem>>, vector<128x128xf32>
    %cst_10 = arith.constant 0.000000e+00 : f32
    %9 = vector.broadcast %cst_10 : f32 to vector<8x128xf32>
    %c0_11 = arith.constant 0 : index
    %c0_12 = arith.constant 0 : index
    %10 = vector.load %arg6[%c0_11, %c0_12] : memref<64x128xf32, #tpu.memory_space<vmem>>, vector<8x128xf32>
    %cst_13 = arith.constant dense<0.000000e+00> : vector<8x128xf32>
    %11 = tpu.matmul %9, %8, %cst_13 {dimension_numbers = #tpu.dot_dimension_numbers<[1], [0], [0], [1], [0, 0, 1, 1], [], []>} : vector<8x128xf32>, vector<128x128xf32>, vector<8x128xf32> -> vector<8x128xf32>
    %12 = arith.addf %10, %11 : vector<8x128xf32>
    %cst_14 = arith.constant 0.000000e+00 : f32
    %13 = vector.broadcast %cst_14 : f32 to vector<8x128xf32>
    %14 = arith.maximumf %12, %13 : vector<8x128xf32>
    %c8 = arith.constant 8 : index
    %c0_15 = arith.constant 0 : index
    %15 = vector.load %arg6[%c8, %c0_15] : memref<64x128xf32, #tpu.memory_space<vmem>>, vector<8x128xf32>
    %cst_16 = arith.constant dense<0.000000e+00> : vector<8x128xf32>
    %16 = tpu.matmul %14, %8, %cst_16 {dimension_numbers = #tpu.dot_dimension_numbers<[1], [0], [0], [1], [0, 0, 1, 1], [], []>} : vector<8x128xf32>, vector<128x128xf32>, vector<8x128xf32> -> vector<8x128xf32>
    %17 = arith.addf %15, %16 : vector<8x128xf32>
    %cst_17 = arith.constant 0.000000e+00 : f32
    %18 = vector.broadcast %cst_17 : f32 to vector<8x128xf32>
    %19 = arith.maximumf %17, %18 : vector<8x128xf32>
    %c16 = arith.constant 16 : index
    %c0_18 = arith.constant 0 : index
    %20 = vector.load %arg6[%c16, %c0_18] : memref<64x128xf32, #tpu.memory_space<vmem>>, vector<8x128xf32>
    %cst_19 = arith.constant dense<0.000000e+00> : vector<8x128xf32>
    %21 = tpu.matmul %19, %8, %cst_19 {dimension_numbers = #tpu.dot_dimension_numbers<[1], [0], [0], [1], [0, 0, 1, 1], [], []>} : vector<8x128xf32>, vector<128x128xf32>, vector<8x128xf32> -> vector<8x128xf32>
    %22 = arith.addf %20, %21 : vector<8x128xf32>
    %cst_20 = arith.constant 0.000000e+00 : f32
    %23 = vector.broadcast %cst_20 : f32 to vector<8x128xf32>
    %24 = arith.maximumf %22, %23 : vector<8x128xf32>
    %c24 = arith.constant 24 : index
    %c0_21 = arith.constant 0 : index
    %25 = vector.load %arg6[%c24, %c0_21] : memref<64x128xf32, #tpu.memory_space<vmem>>, vector<8x128xf32>
    %cst_22 = arith.constant dense<0.000000e+00> : vector<8x128xf32>
    %26 = tpu.matmul %24, %8, %cst_22 {dimension_numbers = #tpu.dot_dimension_numbers<[1], [0], [0], [1], [0, 0, 1, 1], [], []>} : vector<8x128xf32>, vector<128x128xf32>, vector<8x128xf32> -> vector<8x128xf32>
    %27 = arith.addf %25, %26 : vector<8x128xf32>
    %cst_23 = arith.constant 0.000000e+00 : f32
    %28 = vector.broadcast %cst_23 : f32 to vector<8x128xf32>
    %29 = arith.maximumf %27, %28 : vector<8x128xf32>
    %c32 = arith.constant 32 : index
    %c0_24 = arith.constant 0 : index
    %30 = vector.load %arg6[%c32, %c0_24] : memref<64x128xf32, #tpu.memory_space<vmem>>, vector<8x128xf32>
    %cst_25 = arith.constant dense<0.000000e+00> : vector<8x128xf32>
    %31 = tpu.matmul %29, %8, %cst_25 {dimension_numbers = #tpu.dot_dimension_numbers<[1], [0], [0], [1], [0, 0, 1, 1], [], []>} : vector<8x128xf32>, vector<128x128xf32>, vector<8x128xf32> -> vector<8x128xf32>
    %32 = arith.addf %30, %31 : vector<8x128xf32>
    %cst_26 = arith.constant 0.000000e+00 : f32
    %33 = vector.broadcast %cst_26 : f32 to vector<8x128xf32>
    %34 = arith.maximumf %32, %33 : vector<8x128xf32>
    %c40 = arith.constant 40 : index
    %c0_27 = arith.constant 0 : index
    %35 = vector.load %arg6[%c40, %c0_27] : memref<64x128xf32, #tpu.memory_space<vmem>>, vector<8x128xf32>
    %cst_28 = arith.constant dense<0.000000e+00> : vector<8x128xf32>
    %36 = tpu.matmul %34, %8, %cst_28 {dimension_numbers = #tpu.dot_dimension_numbers<[1], [0], [0], [1], [0, 0, 1, 1], [], []>} : vector<8x128xf32>, vector<128x128xf32>, vector<8x128xf32> -> vector<8x128xf32>
    %37 = arith.addf %35, %36 : vector<8x128xf32>
    %cst_29 = arith.constant 0.000000e+00 : f32
    %38 = vector.broadcast %cst_29 : f32 to vector<8x128xf32>
    %39 = arith.maximumf %37, %38 : vector<8x128xf32>
    %c48 = arith.constant 48 : index
    %c0_30 = arith.constant 0 : index
    %40 = vector.load %arg6[%c48, %c0_30] : memref<64x128xf32, #tpu.memory_space<vmem>>, vector<8x128xf32>
    %cst_31 = arith.constant dense<0.000000e+00> : vector<8x128xf32>
    %41 = tpu.matmul %39, %8, %cst_31 {dimension_numbers = #tpu.dot_dimension_numbers<[1], [0], [0], [1], [0, 0, 1, 1], [], []>} : vector<8x128xf32>, vector<128x128xf32>, vector<8x128xf32> -> vector<8x128xf32>
    %42 = arith.addf %40, %41 : vector<8x128xf32>
    %cst_32 = arith.constant 0.000000e+00 : f32
    %43 = vector.broadcast %cst_32 : f32 to vector<8x128xf32>
    %44 = arith.maximumf %42, %43 : vector<8x128xf32>
    %c56 = arith.constant 56 : index
    %c0_33 = arith.constant 0 : index
    %45 = vector.load %arg6[%c56, %c0_33] : memref<64x128xf32, #tpu.memory_space<vmem>>, vector<8x128xf32>
    %cst_34 = arith.constant dense<0.000000e+00> : vector<8x128xf32>
    %46 = tpu.matmul %44, %8, %cst_34 {dimension_numbers = #tpu.dot_dimension_numbers<[1], [0], [0], [1], [0, 0, 1, 1], [], []>} : vector<8x128xf32>, vector<128x128xf32>, vector<8x128xf32> -> vector<8x128xf32>
    %47 = arith.addf %45, %46 : vector<8x128xf32>
    %cst_35 = arith.constant 0.000000e+00 : f32
    %48 = vector.broadcast %cst_35 : f32 to vector<8x128xf32>
    %49 = arith.maximumf %47, %48 : vector<8x128xf32>
    %c0_36 = arith.constant 0 : index
    %c0_37 = arith.constant 0 : index
    %50 = vector.load %arg5[%c0_36, %c0_37] : memref<8x128xf32, #tpu.memory_space<vmem>>, vector<8x128xf32>
    tpu.vector_store %arg5[%c0_36, %c0_37], %49 {strides = array<i32>} : memref<8x128xf32, #tpu.memory_space<vmem>>, vector<8x128xf32>,
    return
  }
  func.func @transform_0(%arg0: i32) -> (i32, i32, i32) {
    %c0_i32 = arith.constant 0 : i32
    %c0_i32_0 = arith.constant 0 : i32
    %c0_i32_1 = arith.constant 0 : i32
    return %arg0, %c0_i32, %c0_i32_0 : i32, i32, i32
  }
  func.func @transform_1(%arg0: i32) -> (i32, i32) {
    %c0_i32 = arith.constant 0 : i32
    %c0_i32_0 = arith.constant 0 : i32
    %c0_i32_1 = arith.constant 0 : i32
    return %c0_i32, %c0_i32_0 : i32, i32
  }
  func.func @transform_2(%arg0: i32) -> (i32, i32) {
    %c0_i32 = arith.constant 0 : i32
    %c0_i32_0 = arith.constant 0 : i32
    %c0_i32_1 = arith.constant 0 : i32
    return %c0_i32, %c0_i32_0 : i32, i32
  }
  func.func @transform_3(%arg0: i32) -> (i32, i32) {
    %c0_i32 = arith.constant 0 : i32
    %c0_i32_0 = arith.constant 0 : i32
    %c0_i32_1 = arith.constant 0 : i32
    return %c0_i32, %c0_i32_0 : i32, i32
  }
  func.func @transform_4(%arg0: i32) -> (i32, i32) {
    %c0_i32 = arith.constant 0 : i32
    %c0_i32_0 = arith.constant 0 : i32
    return %arg0, %c0_i32 : i32, i32
  }
}

</mosaic_0001>

<bundles_post_ra>
// kernel: sentence_encoder_forward_batched.1
= control target key start
LH: loop header
LB: loop body
LE: loop exit
PB: predicated region body
PF: predicated region fallthrough
CT: control target
= control target key end

     0   :  { %vm37_vm0 = vcmask 523264   ;;  %v326_v25 = vmov 0.0   ;;  %s622_s2 = inlined_call_operand.vmem [shape: f32[128,128], index: 2, kind: input, shape index: {}]   ;;  %s623_s1 = inlined_call_operand.vmem [shape: f32[64,128], index: 1, kind: input, shape index: {}]   ;;  %s624_s3 = inlined_call_operand.vmem [shape: f32[1,128], index: 3, kind: input, shape index: {}]   ;;  %s625_s0 = inlined_call_operand.vmem [shape: f32[1,64,64], index: 0, kind: input, shape index: {}]   ;;  %s626_s4 = inlined_call_operand.vmem [shape: f32[8,128], index: 4, kind: output, shape index: {}]  }
   0x1   :  { %v355_v0 = vld [vmem:[%s622_s2 + $0x78] sm:$0xff]  ;;  %v360_v1 = vld [vmem:[%s622_s2 + $0x70] sm:$0xff]  ;;  %v367_v2 = vld [vmem:[%s622_s2 + $0x68] sm:$0xff] }
   0x2   :  { %128 = vmatpush.msra.mxu1 %v355_v0  ;;  %151 = vmatpush.msra.mxu2 %v355_v0  ;;  %v32_v3 = vld [vmem:[%s623_s1 + $0x38] sm:$0xff]  ;;  %v31_v4 = vld [vmem:[%s623_s1 + $0x30] sm:$0xff]  ;;  %v380_v5 = vld [vmem:[%s622_s2 + $0x60] sm:$0xff] }
   0x3   :  { %174 = vmatpush.msra.mxu3 %v355_v0  ;;  %70 = vmatpush.msra.mxu0 %v32_v3  ;;  %v30_v6 = vld [vmem:[%s623_s1 + $0x28] sm:$0xff]  ;;  %v391_v7 = vld [vmem:[%s622_s2 + $0x58] sm:$0xff]  ;;  %v29_v8 = vld [vmem:[%s623_s1 + $0x20] sm:$0xff] }
   0x4   :  { %129 = vmatpush.msra.mxu1 %v360_v1  ;;  %152 = vmatpush.msra.mxu2 %v360_v1  ;;  %v402_v9 = vld [vmem:[%s622_s2 + $0x50] sm:$0xff]  ;;  %v28_v10 = vld [vmem:[%s623_s1 + $0x18] sm:$0xff]  ;;  %v413_v11 = vld [vmem:[%s622_s2 + $0x48] sm:$0xff] }
   0x5   :  { %175 = vmatpush.msra.mxu3 %v360_v1  ;;  %71 = vmatpush.msra.mxu0 %v31_v4  ;;  %v27_v12 = vld [vmem:[%s623_s1 + $0x10] sm:$0xff]  ;;  %v424_v13 = vld [vmem:[%s622_s2 + $0x40] sm:$0xff]  ;;  %v26_v14 = vld [vmem:[%s623_s1 + $0x8] sm:$0xff] }
   0x6   :  { %130 = vmatpush.msra.mxu1 %v367_v2  ;;  %153 = vmatpush.msra.mxu2 %v367_v2  ;;  %v435_v15 = vld [vmem:[%s622_s2 + $0x38] sm:$0xff]  ;;  %v25_v16 = vld [vmem:[%s623_s1] sm:$0xff]  ;;  %v449_v18 = vld [vmem:[%s622_s2 + $0x30] sm:$0xff] }
   0x7   :  { %176 = vmatpush.msra.mxu3 %v367_v2  ;;  %72 = vmatpush.msra.mxu0 %v30_v6  ;;  %v17_v17 = vld [vmem:[%s625_s0] sm:$0xff]  ;;  %v457_v19 = vld [vmem:[%s622_s2 + $0x28] sm:$0xff]  ;;  %v475_v21 = vld [vmem:[%s622_s2 + $0x18] sm:$0xff] }
   0x8   :  { %131 = vmatpush.msra.mxu1 %v380_v5  ;;  %154 = vmatpush.msra.mxu2 %v380_v5  ;;  %v466_v20 = vld [vmem:[%s622_s2 + $0x20] sm:$0xff]  ;;  %v484_v22 = vld [vmem:[%s622_s2 + $0x10] sm:$0xff]  ;;  %v493_v23 = vld [vmem:[%s622_s2 + $0x8] sm:$0xff] }
   0x9   :  { %177 = vmatpush.msra.mxu3 %v380_v5  ;;  %73 = vmatpush.msra.mxu0 %v29_v8  ;;  %v502_v24 = vld [vmem:[%s622_s2] sm:$0xff]  ;;  %v18_v26 = vld [vmem:[%s625_s0 + $0x8] sm:$0xff]  ;;  %v19_v33 = vld [vmem:[%s625_s0 + $0x10] sm:$0xff] }
   0xa   :  { %132 = vmatpush.msra.mxu1 %v391_v7  ;;  %155 = vmatpush.msra.mxu2 %v391_v7  ;;  %v325_v27 = vld [vmem:[%s624_s3] ss:$0 sm:$0xff]  ;;  %v20_v39 = vld [vmem:[%s625_s0 + $0x18] sm:$0xff]  ;;  %v22_v51 = vld [vmem:[%s625_s0 + $0x28] sm:$0xff] }
   0xb   :  { %178 = vmatpush.msra.mxu3 %v391_v7  ;;  %74 = vmatpush.msra.mxu0 %v28_v10  ;;  %v21_v45 = vld [vmem:[%s625_s0 + $0x20] sm:$0xff]  ;;  %v23_v52 = vld [vmem:[%s625_s0 + $0x30] sm:$0xff]  ;;  %v24_v53 = vld [vmem:[%s625_s0 + $0x38] sm:$0xff] }
   0xc   :  { %133 = vmatpush.msra.mxu1 %v402_v9  ;;  %156 = vmatpush.msra.mxu2 %v402_v9 }
   0xd   :  { %179 = vmatpush.msra.mxu3 %v402_v9  ;;  %75 = vmatpush.msra.mxu0 %v27_v12 }
   0xe   :  { %134 = vmatpush.msra.mxu1 %v413_v11  ;;  %157 = vmatpush.msra.mxu2 %v413_v11 }
   0xf   :  { %180 = vmatpush.msra.mxu3 %v413_v11  ;;  %76 = vmatpush.msra.mxu0 %v26_v14 }
  0x10   :  { %135 = vmatpush.msra.mxu1 %v424_v13  ;;  %158 = vmatpush.msra.mxu2 %v424_v13 }
  0x11   :  { %181 = vmatpush.msra.mxu3 %v424_v13  ;;  %77 = vmatpush.msra.mxu0 %v25_v16 }
  0x12   :  { %136 = vmatpush.msra.mxu1 %v435_v15  ;;  %316 = vmatmul.msk.f32.vlgmr.msra.gmra.mxu0 %vm37_vm0, %v17_v17 }
  0x13   :  { %159 = vmatpush.msra.mxu2 %v435_v15  ;;  %182 = vmatpush.msra.mxu3 %v435_v15 }
  0x14   :  { %137 = vmatpush.msra.mxu1 %v449_v18  ;;  %266 = vmatpush.msrb.mxu0 %v355_v0 }
  0x15   :  { %160 = vmatpush.msra.mxu2 %v449_v18  ;;  %183 = vmatpush.msra.mxu3 %v449_v18 }
  0x16   :  { %138 = vmatpush.msra.mxu1 %v457_v19  ;;  %267 = vmatpush.msrb.mxu0 %v360_v1 }
  0x17   :  { %161 = vmatpush.msra.mxu2 %v457_v19  ;;  %184 = vmatpush.msra.mxu3 %v457_v19 }
  0x18   :  { %139 = vmatpush.msra.mxu1 %v466_v20  ;;  %268 = vmatpush.msrb.mxu0 %v367_v2 }
  0x19   :  { %162 = vmatpush.msra.mxu2 %v466_v20  ;;  %185 = vmatpush.msra.mxu3 %v466_v20 }
  0x1a   :  { %140 = vmatpush.msra.mxu1 %v475_v21  ;;  %269 = vmatpush.msrb.mxu0 %v380_v5 }
  0x1b   :  { %163 = vmatpush.msra.mxu2 %v475_v21  ;;  %186 = vmatpush.msra.mxu3 %v475_v21 }
  0x1c   :  { %141 = vmatpush.msra.mxu1 %v484_v22  ;;  %270 = vmatpush.msrb.mxu0 %v391_v7 }
  0x1d   :  { %164 = vmatpush.msra.mxu2 %v484_v22  ;;  %187 = vmatpush.msra.mxu3 %v484_v22 }
  0x1e   :  { %142 = vmatpush.msra.mxu1 %v493_v23  ;;  %271 = vmatpush.msrb.mxu0 %v402_v9 }
  0x1f   :  { %165 = vmatpush.msra.mxu2 %v493_v23  ;;  %188 = vmatpush.msra.mxu3 %v493_v23 }
  0x20   :  { %143 = vmatpush.msra.mxu1 %v502_v24  ;;  %272 = vmatpush.msrb.mxu0 %v413_v11 }
  0x21   :  { %144 = vmatmul.f32.vlgmr.msra.gmra.mxu1 %v326_v25  ;;  %166 = vmatpush.msra.mxu2 %v502_v24 }
  0x22   :  { %189 = vmatpush.msra.mxu3 %v502_v24  ;;  %197 = vmatpush.msrb.mxu1 %v355_v0 }
  0x23   :  { %220 = vmatpush.msrb.mxu2 %v355_v0  ;;  %273 = vmatpush.msrb.mxu0 %v424_v13 }
  0x24   :  { %243 = vmatpush.msrb.mxu3 %v355_v0  ;;  %198 = vmatpush.msrb.mxu1 %v360_v1 }
  0x25   :  { %221 = vmatpush.msrb.mxu2 %v360_v1  ;;  %274 = vmatpush.msrb.mxu0 %v435_v15 }
  0x26   :  { %244 = vmatpush.msrb.mxu3 %v360_v1  ;;  %199 = vmatpush.msrb.mxu1 %v367_v2 }
  0x27   :  { %222 = vmatpush.msrb.mxu2 %v367_v2  ;;  %275 = vmatpush.msrb.mxu0 %v449_v18 }
  0x28   :  { %245 = vmatpush.msrb.mxu3 %v367_v2  ;;  %200 = vmatpush.msrb.mxu1 %v380_v5 }
  0x29   :  { %223 = vmatpush.msrb.mxu2 %v380_v5  ;;  %276 = vmatpush.msrb.mxu0 %v457_v19 }
  0x2a   :  { %246 = vmatpush.msrb.mxu3 %v380_v5  ;;  %201 = vmatpush.msrb.mxu1 %v391_v7 }
  0x2b   :  { %224 = vmatpush.msrb.mxu2 %v391_v7  ;;  %277 = vmatpush.msrb.mxu0 %v466_v20 }
  0x2c   :  { %247 = vmatpush.msrb.mxu3 %v391_v7  ;;  %202 = vmatpush.msrb.mxu1 %v402_v9 }
  0x2d   :  { %225 = vmatpush.msrb.mxu2 %v402_v9  ;;  %278 = vmatpush.msrb.mxu0 %v475_v21 }
  0x2e   :  { %248 = vmatpush.msrb.mxu3 %v402_v9  ;;  %203 = vmatpush.msrb.mxu1 %v413_v11 }
  0x2f   :  { %226 = vmatpush.msrb.mxu2 %v413_v11  ;;  %279 = vmatpush.msrb.mxu0 %v484_v22 }
  0x30   :  { %249 = vmatpush.msrb.mxu3 %v413_v11  ;;  %204 = vmatpush.msrb.mxu1 %v424_v13 }
  0x31   :  { %227 = vmatpush.msrb.mxu2 %v424_v13  ;;  %280 = vmatpush.msrb.mxu0 %v493_v23 }
  0x32   :  { %250 = vmatpush.msrb.mxu3 %v424_v13  ;;  %205 = vmatpush.msrb.mxu1 %v435_v15 }
  0x33   :  { %228 = vmatpush.msrb.mxu2 %v435_v15  ;;  %281 = vmatpush.msrb.mxu0 %v502_v24 }
  0x34   :  { %251 = vmatpush.msrb.mxu3 %v435_v15  ;;  %206 = vmatpush.msrb.mxu1 %v449_v18 }
  0x35   :  { %229 = vmatpush.msrb.mxu2 %v449_v18  ;;  %317 = vmatmul.msk.f32.gmra.mxu0 %vm37_vm0, %v18_v26 }
  0x36   :  { %252 = vmatpush.msrb.mxu3 %v449_v18  ;;  %207 = vmatpush.msrb.mxu1 %v457_v19 }
  0x37   :  { %230 = vmatpush.msrb.mxu2 %v457_v19 }
  0x38   :  { %253 = vmatpush.msrb.mxu3 %v457_v19  ;;  %208 = vmatpush.msrb.mxu1 %v466_v20 }
  0x39   :  { %231 = vmatpush.msrb.mxu2 %v466_v20 }
  0x3a   :  { %254 = vmatpush.msrb.mxu3 %v466_v20  ;;  %209 = vmatpush.msrb.mxu1 %v475_v21 }
  0x3b   :  { %232 = vmatpush.msrb.mxu2 %v475_v21 }
  0x3c   :  { %255 = vmatpush.msrb.mxu3 %v475_v21  ;;  %210 = vmatpush.msrb.mxu1 %v484_v22 }
  0x3d   :  { %233 = vmatpush.msrb.mxu2 %v484_v22  ;;  %318 = vmatmul.msk.f32.gmra.mxu0 %vm37_vm0, %v19_v33 }
  0x3e   :  { %256 = vmatpush.msrb.mxu3 %v484_v22  ;;  %211 = vmatpush.msrb.mxu1 %v493_v23 }
  0x3f   :  { %234 = vmatpush.msrb.mxu2 %v493_v23 }
  0x40   :  { %257 = vmatpush.msrb.mxu3 %v493_v23  ;;  %212 = vmatpush.msrb.mxu1 %v502_v24 }
  0x41   :  { %235 = vmatpush.msrb.mxu2 %v502_v24 }
  0x42   :  { %258 = vmatpush.msrb.mxu3 %v502_v24  ;;  %289 = vmatpush.msra.mxu1 %v355_v0 }
  0x44   :  { %290 = vmatpush.msra.mxu1 %v360_v1 }
  0x45   :  { %319 = vmatmul.msk.f32.gmra.mxu0 %vm37_vm0, %v20_v39 }
  0x46   :  { %291 = vmatpush.msra.mxu1 %v367_v2 }
  0x48   :  { %292 = vmatpush.msra.mxu1 %v380_v5 }
  0x4a   :  { %293 = vmatpush.msra.mxu1 %v391_v7 }
  0x4c   :  { %294 = vmatpush.msra.mxu1 %v402_v9 }
  0x4d   :  { %320 = vmatmul.msk.f32.gmra.mxu0 %vm37_vm0, %v21_v45 }
  0x4e   :  { %295 = vmatpush.msra.mxu1 %v413_v11 }
  0x50   :  { %296 = vmatpush.msra.mxu1 %v424_v13 }
  0x52   :  { %297 = vmatpush.msra.mxu1 %v435_v15 }
  0x54   :  { %298 = vmatpush.msra.mxu1 %v449_v18 }
  0x55   :  { %321 = vmatmul.msk.f32.gmra.mxu0 %vm37_vm0, %v22_v51 }
  0x56   :  { %299 = vmatpush.msra.mxu1 %v457_v19 }
  0x58   :  { %300 = vmatpush.msra.mxu1 %v466_v20 }
  0x5a   :  { %301 = vmatpush.msra.mxu1 %v475_v21 }
  0x5c   :  { %302 = vmatpush.msra.mxu1 %v484_v22 }
  0x5d   :  { %322 = vmatmul.msk.f32.gmra.mxu0 %vm37_vm0, %v23_v52 }
  0x5e   :  { %303 = vmatpush.msra.mxu1 %v493_v23 }
  0x60   :  { %304 = vmatpush.msra.mxu1 %v502_v24 }
  0x65   :  { %323 = vmatmul.msk.f32.gmra.mxu0 %vm37_vm0, %v24_v53 }
  0x8f   :  { %v79_v28 = vpop.f32.mrf.mxu0 }
  0x90   :  { %v80_v29 = vadd.f32 %v325_v27, %v79_v28 }
  0x9e   :  { %v145_v30 = vpop.f32.mrf.mxu1 }
  0x9f   :  { %v148_v31 = vadd.f32 %v145_v30, %v80_v29 }
  0xa1   :  { %v149_v32 = vmax.f32 %v148_v31, 0.0 }
  0xa3   :  { %167 = vmatmul.f32.vlgmr.msra.gmra.mxu2 %v149_v32 }
  0xb2   :  { %v82_v34 = vpop.f32.mrf.mxu0 }
  0xb3   :  { %v83_v35 = vadd.f32 %v325_v27, %v82_v34 }
  0xba   :  { %v85_v40 = vpop.f32.mrf.mxu0 }
  0xbb   :  { %v86_v41 = vadd.f32 %v325_v27, %v85_v40 }
  0xc2   :  { %v88_v46 = vpop.f32.mrf.mxu0 }
  0xc3   :  { %v89_v47 = vadd.f32 %v325_v27, %v88_v46 }
  0xca   :  { %v91_v54 = vpop.f32.mrf.mxu0 }
  0xcb   :  { %v92_v55 = vadd.f32 %v325_v27, %v91_v54 }
  0xd2   :  { %v94_v59 = vpop.f32.mrf.mxu0 }
  0xd3   :  { %v95_v60 = vadd.f32 %v325_v27, %v94_v59 }
  0xda   :  { %v97_v0 = vpop.f32.mrf.mxu0 }
  0xdb   :  { %v98_v2 = vadd.f32 %v325_v27, %v97_v0 }
  0xe2   :  { %v100_v1 = vpop.f32.mrf.mxu0 }
  0xe3   :  { %v101_v6 = vadd.f32 %v325_v27, %v100_v1 }
 0x126   :  { %v168_v36 = vpop.f32.mrf.mxu2 }
 0x127   :  { %v171_v37 = vadd.f32 %v168_v36, %v83_v35 }
 0x129   :  { %v172_v38 = vmax.f32 %v171_v37, 0.0 }
 0x12b   :  { %190 = vmatmul.f32.vlgmr.msra.gmra.mxu3 %v172_v38 }
 0x1ae   :  { %v191_v42 = vpop.f32.mrf.mxu3 }
 0x1af   :  { %v194_v43 = vadd.f32 %v191_v42, %v86_v41 }
 0x1b1   :  { %v195_v44 = vmax.f32 %v194_v43, 0.0 }
 0x1b3   :  { %213 = vmatmul.f32.vlgmr.msrb.gmra.mxu1 %v195_v44 }
 0x230   :  { %v214_v48 = vpop.f32.mrf.mxu1 }
 0x231   :  { %v217_v49 = vadd.f32 %v214_v48, %v89_v47 }
 0x233   :  { %v218_v50 = vmax.f32 %v217_v49, 0.0 }
 0x235   :  { %236 = vmatmul.f32.vlgmr.msrb.gmra.mxu2 %v218_v50 }
 0x2b8   :  { %v237_v56 = vpop.f32.mrf.mxu2 }
 0x2b9   :  { %v240_v57 = vadd.f32 %v237_v56, %v92_v55 }
 0x2bb   :  { %v241_v58 = vmax.f32 %v240_v57, 0.0 }
 0x2bd   :  { %259 = vmatmul.f32.vlgmr.msrb.gmra.mxu3 %v241_v58 }
 0x340   :  { %v260_v61 = vpop.f32.mrf.mxu3 }
 0x341   :  { %v263_v62 = vadd.f32 %v260_v61, %v95_v60 }
 0x343   :  { %v264_v63 = vmax.f32 %v263_v62, 0.0 }
 0x345   :  { %282 = vmatmul.f32.vlgmr.msrb.gmra.mxu0 %v264_v63 }
 0x3c2   :  { %v283_v3 = vpop.f32.mrf.mxu0 }
 0x3c3   :  { %v286_v4 = vadd.f32 %v283_v3, %v98_v2 }
 0x3c5   :  { %v287_v5 = vmax.f32 %v286_v4, 0.0 }
 0x3c7   :  { %305 = vmatmul.f32.vlgmr.msra.gmra.mxu1 %v287_v5 }
 0x444   :  { %v306_v7 = vpop.f32.mrf.mxu1 }
 0x445   :  { %v309_v8 = vadd.f32 %v306_v7, %v101_v6 }
 0x447   :  { %v310_v9 = vmax.f32 %v309_v8, 0.0 }
 0x449   :  { %311 = vst [vmem:[%s626_s4] sm:$0xff] %v310_v9 }

</bundles_post_ra>
